<compile_context>
chip_gen: v5e
topology: v5e:2x2
jax: 0.10.0
libtpu: 0.0.40
codegen_flags: <defaults>
</compile_context>

<pallas_src>
import jax
import jax.numpy as jnp
from jax.experimental import pallas as pl
from jax.experimental.pallas import tpu as pltpu


def _round_up(n: int, m: int) -> int:
    return ((n + m - 1) // m) * m


# ----------------------------------------------------------------------------
# Pallas kernel: one M-tile of  y = x @ W_pad + bias_pad   (lane-dense N)
# ----------------------------------------------------------------------------
def _ttm_linear_kernel(x_ref, w_ref, b_ref, o_ref):
    # x_ref : (TM, K)      f32 activation tile (K = dim_in, no zero-pad)
    # w_ref : (K, N_pad)   bf16 dense TT weight, N padded to a multiple of 128
    # b_ref : (1, N_pad)   f32 bias row (zeros beyond dim_out)
    # o_ref : (TM, N_pad)  bf16 output tile (unmasked lane-dense store)
    xb = x_ref[...].astype(jnp.bfloat16)            # in-kernel cast (free VPU work)
    acc = jnp.dot(xb, w_ref[...], preferred_element_type=jnp.float32)
    o_ref[...] = (acc + b_ref[...]).astype(o_ref.dtype)


def _pallas_ttm_matmul(x2, w_pad, b_pad, tm):
    M, K = x2.shape
    _, Np = w_pad.shape
    assert tm % 8 == 0 and Np % 128 == 0

    cost = pl.CostEstimate(
        flops=2 * M * K * Np,
        transcendentals=0,
        bytes_accessed=(
            x2.size * x2.dtype.itemsize
            + w_pad.size * w_pad.dtype.itemsize
            + b_pad.size * b_pad.dtype.itemsize
            + M * Np * 2                            # bf16 output stream
        ),
    )
    return pl.pallas_call(
        _ttm_linear_kernel,
        out_shape=jax.ShapeDtypeStruct((M, Np), jnp.bfloat16),
        grid=(pl.cdiv(M, tm),),                     # partial last block OK
        in_specs=[
            pl.BlockSpec((tm, K), lambda i: (i, 0)),   # activations: tiled over M
            pl.BlockSpec((K, Np), lambda i: (0, 0)),   # weight: VMEM-resident
            pl.BlockSpec((1, Np), lambda i: (0, 0)),   # bias: VMEM-resident
        ],
        out_specs=pl.BlockSpec((tm, Np), lambda i: (i, 0)),
        compiler_params=pltpu.CompilerParams(
            dimension_semantics=("parallel",),         # shard M steps across TCs (v7x)
        ),
        cost_estimate=cost,
    )(x2, w_pad, b_pad)


# ----------------------------------------------------------------------------
# TTM parameterization (deterministic, synthetic — base class leaves `ttm`
# undefined, so a 2-core TT-matrix is instantiated here)
# ----------------------------------------------------------------------------
def make_ttm_params(key, in_factors, out_factors, rank):
    """Two TT cores: G1:(1, I1, O1, R), G2:(R, I2, O2, 1)."""
    i1, i2 = in_factors
    o1, o2 = out_factors
    k1, k2 = jax.random.split(key)
    scale1 = 1.0 / jnp.sqrt(i1)
    scale2 = 1.0 / jnp.sqrt(i2 * rank)
    g1 = jax.random.normal(k1, (1, i1, o1, rank), jnp.float32) * scale1
    g2 = jax.random.normal(k2, (rank, i2, o2, 1), jnp.float32) * scale2
    return g1, g2


def tt_cores_to_dense(g1, g2):
    """Reconstruct dense weight W of shape (I1*I2, O1*O2) from the cores."""
    a = g1[0]          # (I1, O1, R)
    b = g2[..., 0]     # (R, I2, O2)
    w = jnp.einsum("ixr,rjy->ijxy", a, b)  # (I1, I2, O1, O2)
    i1, i2, o1, o2 = w.shape
    return w.reshape(i1 * i2, o1 * o2)


def prepare_ttm_weights(g1, g2, bias, dim_in, dim_out):
    """One-time prep: dense W (rows sliced to dim_in, cols padded to 128·k,
    bf16) and a lane-dense f32 bias row. Hoisted out of the per-call path.

    Note (v5e): K could instead be kept at the TT-padded size (multiple of the
    bf16 sublane pack) with zero rows; at K=30 the kernel is mem-bound so the
    simpler dim_in-row slice is used (x @ W[:dim_in] == x_padded @ W)."""
    ttm_dim_in = g1.shape[1] * g2.shape[1]
    ttm_dim_out = g1.shape[2] * g2.shape[2]
    assert ttm_dim_in >= dim_in and ttm_dim_out >= dim_out

    w = tt_cores_to_dense(g1, g2)                    # (ttm_in, ttm_out) f32
    w = w[:dim_in, :]
    n_pad = _round_up(ttm_dim_out, 128)              # lane-dense output width
    w_pad = jnp.pad(w, ((0, 0), (0, n_pad - ttm_dim_out))).astype(jnp.bfloat16)

    b_pad = jnp.zeros((1, n_pad), jnp.float32)
    if bias is not None:
        b_pad = b_pad.at[0, :dim_out].set(bias.astype(jnp.float32))
    return w_pad, b_pad


# ----------------------------------------------------------------------------
# Module-equivalent forward
# ----------------------------------------------------------------------------
def ttm_linear_forward(x, w_pad, b_pad, dim_in, dim_out, tm=2048):
    """Equivalent of TTMLinearBase.forward (with prepared TT weights).
    Returns bf16 (deliberate dtype contract; accumulation is f32)."""
    x_shape = x.shape
    M = x.size // x_shape[-1]
    x2 = x.reshape(M, dim_in)                        # original dtype; cast in-kernel

    TM = min(tm, _round_up(M, 8))                    # single step when M is small
    out = _pallas_ttm_matmul(x2, w_pad, b_pad, TM)   # (M, N_pad) bf16
    out = out[:, :dim_out]                           # lane-dense kernel store;
    return out.reshape(*x_shape[:-1], dim_out)       # slice is wrapper plumbing


# Pure-JAX reference (mirrors the PyTorch forward literally, in f32).
def ttm_linear_reference(x, g1, g2, bias, dim_in, dim_out):
    ttm_dim_in = g1.shape[1] * g2.shape[1]
    x_shape = x.shape
    x2 = x.reshape(-1, x_shape[-1])
    x2 = jnp.pad(x2, ((0, 0), (0, ttm_dim_in - dim_in)))
    w = tt_cores_to_dense(g1, g2)
    y = x2 @ w
    y = y[:, :dim_out]
    if bias is not None:
        y = y + bias
    return y.reshape(*x_shape[:-1], dim_out)


if __name__ == "__main__":
    # Small, deterministic configuration.
    dim_in, dim_out = 30, 24
    in_factors, out_factors, rank = (4, 8), (4, 8), 3   # ttm.dim_in = ttm.dim_out = 32

    key = jax.random.PRNGKey(0)
    k_x, k_cores, k_b, k_x2 = jax.random.split(key, 4)

    g1, g2 = make_ttm_params(k_cores, in_factors, out_factors, rank)
    bias = jax.random.normal(k_b, (dim_out,), jnp.float32) * 0.1

    # Hoisted (per-layer, not per-call) weight preparation.
    w_pad, b_pad = prepare_ttm_weights(g1, g2, bias, dim_in, dim_out)

    # Tolerances account for bf16 x/W operands and bf16 output vs f32 reference.
    ATOL = RTOL = 3e-2

    # Case 1: tiny batch, single M-tile (M=8 -> TM=8, grid=(1,)).
    x = jax.random.normal(k_x, (2, 4, dim_in), jnp.float32)
    out = ttm_linear_forward(x, w_pad, b_pad, dim_in, dim_out)
    out = jax.block_until_ready(out)
    ref = ttm_linear_reference(x, g1, g2, bias, dim_in, dim_out)
    assert out.shape == (2, 4, dim_out), out.shape
    assert out.dtype == jnp.bfloat16, out.dtype
    err = float(jnp.abs(out.astype(jnp.float32) - ref).max())
    assert jnp.allclose(out.astype(jnp.float32), ref, atol=ATOL, rtol=RTOL), err

    # Case 2: M=120 with TM=64 -> grid=(2,) with a *partial* last block (56
    # rows), exercising the ragged-tail handling (no wrapper-side row pad).
    x_big = jax.random.normal(k_x2, (3, 40, dim_in), jnp.float32)
    out_big = ttm_linear_forward(x_big, w_pad, b_pad, dim_in, dim_out, tm=64)
    out_big = jax.block_until_ready(out_big)
    ref_big = ttm_linear_reference(x_big, g1, g2, bias, dim_in, dim_out)
    assert out_big.shape == (3, 40, dim_out), out_big.shape
    err_big = float(jnp.abs(out_big.astype(jnp.float32) - ref_big).max())
    assert jnp.allclose(out_big.astype(jnp.float32), ref_big, atol=ATOL, rtol=RTOL), err_big

    print("KERNEL_OK")
</pallas_src>

<mosaic_0001>
module attributes {stable_mosaic.version = 11 : i64} {
  func.func @_ttm_linear_kernel(%arg0: i32, %arg1: memref<8x30xf32, #tpu.memory_space<vmem>>, %arg2: memref<30x128xbf16, #tpu.memory_space<vmem>>, %arg3: memref<1x128xf32, #tpu.memory_space<vmem>>, %arg4: memref<8x128xbf16, #tpu.memory_space<vmem>>) attributes {dimension_semantics = [#tpu.dimension_semantics<parallel>], iteration_bounds = array<i64: 1>, scalar_prefetch = 0 : i64, scratch_operands = 0 : i64, tpu.core_type = #tpu.core_type<tc>, window_params = [{transform_indices = @transform_0, window_bounds = array<i64: 8, 30>}, {pipeline_mode = #tpu.pipeline_mode<synchronous>, transform_indices = @transform_1, window_bounds = array<i64: 30, 128>}, {pipeline_mode = #tpu.pipeline_mode<synchronous>, transform_indices = @transform_2, window_bounds = array<i64: 1, 128>}, {transform_indices = @transform_3, window_bounds = array<i64: 8, 128>}]} {
    %c0 = arith.constant 0 : index
    %c0_0 = arith.constant 0 : index
    %0 = vector.load %arg1[%c0, %c0_0] : memref<8x30xf32, #tpu.memory_space<vmem>>, vector<8x30xf32>
    %1 = arith.truncf %0 : vector<8x30xf32> to vector<8x30xbf16>
    %c0_1 = arith.constant 0 : index
    %c0_2 = arith.constant 0 : index
    %2 = vector.load %arg2[%c0_1, %c0_2] : memref<30x128xbf16, #tpu.memory_space<vmem>>, vector<30x128xbf16>
    %cst = arith.constant dense<0.000000e+00> : vector<8x128xf32>
    %3 = tpu.matmul %1, %2, %cst {dimension_numbers = #tpu.dot_dimension_numbers<[1], [0], [0], [1], [0, 0, 1, 1], [], []>} : vector<8x30xbf16>, vector<30x128xbf16>, vector<8x128xf32> -> vector<8x128xf32>
    %c0_3 = arith.constant 0 : index
    %c0_4 = arith.constant 0 : index
    %4 = vector.load %arg3[%c0_3, %c0_4] : memref<1x128xf32, #tpu.memory_space<vmem>>, vector<1x128xf32>
    %5 = vector.broadcast %4 : vector<1x128xf32> to vector<8x128xf32>
    %6 = arith.addf %3, %5 : vector<8x128xf32>
    %7 = arith.truncf %6 : vector<8x128xf32> to vector<8x128xbf16>
    %c0_5 = arith.constant 0 : index
    %c0_6 = arith.constant 0 : index
    %8 = vector.load %arg4[%c0_5, %c0_6] : memref<8x128xbf16, #tpu.memory_space<vmem>>, vector<8x128xbf16>
    tpu.vector_store %arg4[%c0_5, %c0_6], %7 {strides = array<i32>} : memref<8x128xbf16, #tpu.memory_space<vmem>>, vector<8x128xbf16>,
    return
  }
  func.func @transform_0(%arg0: i32) -> (i32, i32) {
    %c0_i32 = arith.constant 0 : i32
    %c0_i32_0 = arith.constant 0 : i32
    return %arg0, %c0_i32 : i32, i32
  }
  func.func @transform_1(%arg0: i32) -> (i32, i32) {
    %c0_i32 = arith.constant 0 : i32
    %c0_i32_0 = arith.constant 0 : i32
    %c0_i32_1 = arith.constant 0 : i32
    return %c0_i32, %c0_i32_0 : i32, i32
  }
  func.func @transform_2(%arg0: i32) -> (i32, i32) {
    %c0_i32 = arith.constant 0 : i32
    %c0_i32_0 = arith.constant 0 : i32
    %c0_i32_1 = arith.constant 0 : i32
    return %c0_i32, %c0_i32_0 : i32, i32
  }
  func.func @transform_3(%arg0: i32) -> (i32, i32) {
    %c0_i32 = arith.constant 0 : i32
    %c0_i32_0 = arith.constant 0 : i32
    return %arg0, %c0_i32 : i32, i32
  }
}

</mosaic_0001>

<bundles_post_ra>
// kernel: tpu_custom_call.1
= control target key start
LH: loop header
LB: loop body
LE: loop exit
PB: predicated region body
PF: predicated region fallthrough
CT: control target
= control target key end

     0   :  { %8 = vsyncpa [#allocation3], 0  ;;  %s240_s0 = inlined_call_operand.hbm [shape: f32[8,30], index: 0, kind: input, shape index: {}]   ;;  %s241_s1 = inlined_call_operand.hbm [shape: bf16[30,128], index: 1, kind: input, shape index: {}]   ;;  %s242_s2 = inlined_call_operand.vmem [shape: f32[1,128], index: 2, kind: input, shape index: {}]   ;;  %s243_s3 = inlined_call_operand.hbm [shape: bf16[8,128], index: 3, kind: output, shape index: {}]  }
   0x1   :  { %9 = vsyncpa [#allocation6], 0 }
   0x2   :  { %10 = vsyncpa [#allocation4], 0  ;;  %s16_s14 = sshll.u32 %s240_s0, 4  ;;  %s203_s15 = smov [#allocation2]   ;;  %s17_s14 = int_to_ptr.hbm [resolvable:$true] %s16_s14 }
   0x3   :  { %s18_s16 = sshll.u32 %s203_s15, 4  ;;  %s26_s19 = sshll.u32 %s241_s1, 4  ;;  %s19_s16 = int_to_ptr.vmem [resolvable:$true] %s18_s16  ;;  %s27_s19 = int_to_ptr.hbm [resolvable:$true] %s26_s19 }
   0x4   :  { %21 = dma.hbm_to_vmem [thread:$0]  %s17_s14, 128, %s19_s16, [#allocation3]  }
   0x5   :  { %s204_s20 = smov [#allocation5]   ;;  %s205_s22 = smov 64  }
   0x6   :  { %s28_s21 = sshll.u32 %s204_s20, 4  ;;  %s206_s23 = smov 4   ;;  %s29_s21 = int_to_ptr.vmem [resolvable:$true] %s28_s21 }
   0x7   :  { %34 = dma.hbm_to_vmem [thread:$0]  %s27_s19, 256, %s29_s21, [#allocation6], %s205_s22, %s205_s22, %s206_s23  }
   0x8   :  { %197 = dma.done.wait [#allocation3], 128  }
   0x9   :  { %198 = vsyncadd [#allocation3], 4294967168 }
   0xa   :  { %199 = dma.done.wait [#allocation6], 256  }
   0xb   :  { %200 = vsyncadd [#allocation6], 4294967040  ;;  %v114_v0 = vld [vmem:[#allocation5 + $0x8] sm:$0xf]  ;;  %v118_v1 = vld [vmem:[#allocation5 + $0x8] sm:$0x70] }
   0xc   :  { %vm71_vm0 = vcmask 1046528   ;;  %v115_v2 = vor.u32 %v118_v1, %v114_v0  ;;  %v117_v4 = vld [vmem:[#allocation5] sm:$0xff]  ;;  %v46_v5 = vld [vmem:[#allocation2] sm:$0xff]  ;;  %vm67_vm1 = vcmask 244736   ;;  %s207_s24 = smov [#allocation7]   ;;  %s97_s28 = sshll.u32 %s243_s3, 4  ;;  %s98_s28 = int_to_ptr.hbm [resolvable:$true] %s97_s28 }
   0xd   :  { %v47_v6 = vpack.c.bf16 %v46_v5, %v46_v5  ;;  %v124_v7 = vld [vmem:[%s242_s2] ss:$0 sm:$0xff]  ;;  %s95_s25 = sshll.u32 %s207_s24, 4  ;;  %s96_s25 = int_to_ptr.vmem [resolvable:$true] %s95_s25 }
   0xe   :  { %v73_v3 = vsel %vm71_vm0, %v115_v2, 0 }
   0xf   :  { %81 = vmatpush.bf16.msra.mxu0 %v73_v3 }
  0x13   :  { %82 = vmatpush.bf16.msra.mxu0 %v117_v4 }
  0x16   :  { %116 = vmatmul.msk.bf16.vlgmr.msra.gmra.mxu0 %vm67_vm1, %v47_v6 }
  0x93   :  { %v84_v8 = vpop.f32.mrf.mxu0 }
  0x94   :  { %v85_v9 = vadd.f32 %v124_v7, %v84_v8 }
  0x96   :  { %v88_v10 = vpack.c.bf16 %v85_v9, %v85_v9 }
  0x98   :  { %89 = vst [vmem:[#allocation7] sm:$0xf] %v88_v10 }
  0x99   :  { %100 = dma.vmem_to_hbm [thread:$0]  %s96_s25, 64, %s98_s28, [#allocation4]  }
  0x9b   :  { %v86_v11 = vpop.f32.mrf.mxu0 }
  0x9c   :  { %201 = dma.done.wait [#allocation4], 64  }
  0x9d   :  { %202 = vsyncadd [#allocation4], 4294967232 }
  0x9e   :  { %105 = vsyncpa [#allocation3], 1 }
  0x9f   :  { %106 = vsyncpa [#allocation6], 1 }
  0xa0   :  { %107 = vsyncpa [#allocation4], 1 }

</bundles_post_ra>
